<compile_context>
chip_gen: v5e
topology: v5e:2x2
jax: 0.10.0
libtpu: 0.0.40
codegen_flags: <defaults>
</compile_context>

<pallas_src>
import jax
import jax.numpy as jnp
from jax import lax
from jax.experimental import pallas as pl
from jax.experimental.pallas import tpu as pltpu


# --------------------------------------------------------------------------- #
# Kernels
# --------------------------------------------------------------------------- #
def _proj_kernel_direct(x_ref, w_ref, b_ref, o_ref):
    # x_ref: (C, thw)  channels on sublanes, HW lane-dense
    # w_ref: (C, E)    pre-transposed nn.Linear weight (grid-resident)
    # b_ref: (1, E)    f32 bias (grid-resident)
    # o_ref: (thw, E)  output tile (lane-dense iff E is a multiple of 128)
    acc = lax.dot_general(
        x_ref[...], w_ref[...],
        dimension_numbers=(((0,), (0,)), ((), ())),   # contract over C
        preferred_element_type=jnp.float32)           # (thw, E), f32 accumulate
    o_ref[...] = (acc + b_ref[...]).astype(o_ref.dtype)


def _proj_kernel_lane_packed(x_ref, w_ref, b_ref, o_ref):
    # Same contraction; the (thw, E<128) tile is folded C-order into
    # (thw*E/128, 128) so the output store and write DMA are fully lane-dense.
    acc = lax.dot_general(
        x_ref[...], w_ref[...],
        dimension_numbers=(((0,), (0,)), ((), ())),
        preferred_element_type=jnp.float32)
    dense = (acc + b_ref[...]).reshape(o_ref.shape)   # C-order fold, in-VMEM
    o_ref[...] = dense.astype(o_ref.dtype)


# --------------------------------------------------------------------------- #
# Sizing helpers
# --------------------------------------------------------------------------- #
def _padded_tile_bytes(rows, cols, dtype):
    """VMEM bytes of a (rows, cols) buffer including (8,128) tiling padding
    (sub-32-bit dtypes pack along sublanes: bf16 pads rows to 16, etc.)."""
    d = jnp.dtype(dtype)
    pack = max(1, 4 // d.itemsize)
    prow = -(-rows // (8 * pack)) * (8 * pack)
    pcol = -(-cols // 128) * 128
    return prow * pcol * d.itemsize


def _tile_vmem_bytes(thw, c, e, in_dtype, out_dtype):
    """Conservative (double-buffered, padded) VMEM footprint of one grid step."""
    return (2 * _padded_tile_bytes(c, thw, in_dtype)        # x tile
            + 2 * _padded_tile_bytes(thw, e, out_dtype)     # out tile (worst-case pad)
            + 2 * _padded_tile_bytes(c, e, in_dtype)        # weight (resident)
            + 2 * _padded_tile_bytes(1, e, jnp.float32))    # bias (resident)


def _vmem_capacity_bytes():
    """Physical per-core VMEM; falls back to the smallest generation (v7x)."""
    try:
        info = pltpu.get_tpu_info()
        for attr in ("vmem_capacity_bytes", "vmem_size_bytes", "vmem_bytes"):
            v = getattr(info, attr, None)
            if v:
                return int(v)
    except Exception:
        pass
    return 64 * 1024 * 1024


def _pick_hw_tile(hw, batch, c, e, in_dtype, out_dtype, target_rows, budget):
    """Largest HW tile that (a) is a 128-multiple divisor of HW (or HW itself),
    (b) fits the padded, double-buffered VMEM budget, and (c) leaves the grid
    with >= 2 steps when possible (v7x has 2 TensorCores)."""
    def fits(t):
        return _tile_vmem_bytes(t, c, e, in_dtype, out_dtype) <= budget

    cands = sorted({t for t in range(128, hw + 1, 128) if hw % t == 0} | {hw})
    limit = max(int(target_rows), 128)
    ok = [t for t in cands if t <= limit and fits(t)]
    if ok:
        t = max(ok)
    else:
        fit_all = [t for t in cands if fits(t)]
        t = min(fit_all) if fit_all else cands[0]
    if batch * (hw // t) < 2:                       # keep both v7x cores busy
        smaller = [s for s in cands if s <= hw // 2 and fits(s)]
        if smaller:
            t = max(smaller)
    return t


# --------------------------------------------------------------------------- #
# pallas_call builder
# --------------------------------------------------------------------------- #
def _projection_call(x3, w_t, b2d, *, B, C, HW, E, thw, out_dtype, lane_pack,
                     vmem_limit, cost):
    n_hw = HW // thw
    in_specs = [
        pl.BlockSpec((pl.Squeezed(), C, thw), lambda b, i: (b, 0, i)),  # x (NCHW)
        pl.BlockSpec((C, E), lambda b, i: (0, 0)),                      # weight
        pl.BlockSpec((1, E), lambda b, i: (0, 0)),                      # bias
    ]
    if lane_pack:
        rows_all, rows_blk = HW * E // 128, thw * E // 128
        kernel = _proj_kernel_lane_packed
        out_shape = jax.ShapeDtypeStruct((B, rows_all, 128), out_dtype)
        out_spec = pl.BlockSpec((pl.Squeezed(), rows_blk, 128),
                                lambda b, i: (b, i, 0))
    else:
        kernel = _proj_kernel_direct
        out_shape = jax.ShapeDtypeStruct((B, HW, E), out_dtype)
        out_spec = pl.BlockSpec((pl.Squeezed(), thw, E), lambda b, i: (b, i, 0))

    out = pl.pallas_call(
        kernel,
        out_shape=out_shape,
        grid_spec=pltpu.PrefetchScalarGridSpec(
            num_scalar_prefetch=0,
            grid=(B, n_hw),
            in_specs=in_specs,
            out_specs=out_spec,
        ),
        compiler_params=pltpu.CompilerParams(
            dimension_semantics=("parallel", "parallel"),
            vmem_limit_bytes=vmem_limit,
        ),
        cost_estimate=cost,
    )(x3, w_t, b2d)

    return out.reshape(B, HW, E) if lane_pack else out


# --------------------------------------------------------------------------- #
# Public wrapper (matches MLP.forward: proj(x.flatten(2).transpose(1, 2)))
# --------------------------------------------------------------------------- #
def mlp_forward(x_nchw, weight, bias, *, out_dtype=None, target_rows=2048,
                vmem_budget_bytes=None):
    """Args:
      x_nchw: (B, C, H, W) input (NCHW, matching the PyTorch module).  Pass
        bf16 activations to halve HBM read traffic on v6e/v7x — no wrapper
        cast is performed here (it would be an extra HBM pass; on v5e it is
        proportionally even more expensive).
      weight: (E, C) — nn.Linear.weight layout.
      bias:   (E,)   — nn.Linear.bias layout.
      out_dtype: optional output dtype (e.g. jnp.bfloat16) to halve the output
        write stream; accumulation and bias add stay f32.
    Returns: (B, H*W, E)."""
    B, C, H, W = x_nchw.shape
    E = weight.shape[0]
    HW = H * W
    in_dtype = jnp.dtype(x_nchw.dtype)
    out_dtype = jnp.dtype(out_dtype) if out_dtype is not None else in_dtype

    x3 = x_nchw.reshape(B, C, HW)                     # free contiguous reshape
    w_t = weight.T.astype(in_dtype)                   # (C, E), tiny
    b2d = bias.reshape(1, E).astype(jnp.float32)      # bias added in f32

    cap = _vmem_capacity_bytes()                      # 64 MiB v7x / 128 MiB v5e,v6e
    budget = int(cap * 0.70) if vmem_budget_bytes is None else int(vmem_budget_bytes)
    budget = min(budget, int(cap * 0.85))

    thw = _pick_hw_tile(HW, B, C, E, in_dtype, out_dtype, target_rows, budget)
    assert HW % thw == 0
    need = _tile_vmem_bytes(thw, C, E, in_dtype, out_dtype) + (2 << 20)
    vmem_limit = int(min(max(need, 32 << 20), int(cap * 0.85)))

    cost = pl.CostEstimate(
        flops=2 * B * HW * C * E,
        transcendentals=0,
        bytes_accessed=(B * C * HW * in_dtype.itemsize          # x read
                        + C * E * in_dtype.itemsize + E * 4     # params
                        + B * HW * E * out_dtype.itemsize))     # out write

    common = dict(B=B, C=C, HW=HW, E=E, thw=thw, out_dtype=out_dtype,
                  vmem_limit=vmem_limit, cost=cost)

    lane_pack_ok = (E < 128 and 128 % E == 0
                    and (HW * E) % 128 == 0 and (thw * E) % 128 == 0
                    and (((thw * E) // 128) % 8 == 0 or thw == HW))
    if lane_pack_ok:
        try:
            out = _projection_call(x3, w_t, b2d, lane_pack=True, **common)
            jax.block_until_ready(out)   # surface lowering/runtime errors here
            return out
        except Exception:
            # Mosaic on this toolchain can't lower the in-kernel C-order fold;
            # fall back to the (correct, slightly less store-dense) direct path.
            pass
    return _projection_call(x3, w_t, b2d, lane_pack=False, **common)


def _reference(x_nchw, weight, bias):
    B, C, H, W = x_nchw.shape
    xt = jnp.transpose(x_nchw.reshape(B, C, H * W), (0, 2, 1))  # (B, HW, C)
    return jnp.einsum("bnc,ec->bne", xt.astype(jnp.float32),
                      weight.astype(jnp.float32)) + bias.astype(jnp.float32)


if __name__ == "__main__":
    key = jax.random.PRNGKey(0)
    k_x, k_w, k_b = jax.random.split(key, 3)

    # Small shapes consistent with the module: input_dim=C=4, embed_dim=E=32.
    B, C, H, W = 2, 4, 16, 16
    E = 32

    x = jax.random.normal(k_x, (B, C, H, W), dtype=jnp.float32)
    weight = jax.random.normal(k_w, (E, C), dtype=jnp.float32) * 0.02
    bias = jax.random.normal(k_b, (E,), dtype=jnp.float32) * 0.02

    y_ref = _reference(x, weight, bias)

    # f32 path: exact check against the reference.
    y = jax.block_until_ready(mlp_forward(x, weight, bias))
    assert y.shape == (B, H * W, E), y.shape
    assert jnp.allclose(y, y_ref, atol=1e-5, rtol=1e-5), float(
        jnp.max(jnp.abs(y - y_ref)))

    # bf16 activations + bf16 output: halves both dominant HBM streams on
    # v6e/v7x.  The caller owns the activation dtype, so there is no extra
    # wrapper-side cast pass.
    x_bf16 = x.astype(jnp.bfloat16)
    y_bf16 = jax.block_until_ready(
        mlp_forward(x_bf16, weight, bias, out_dtype=jnp.bfloat16))
    assert y_bf16.shape == (B, H * W, E), y_bf16.shape
    assert y_bf16.dtype == jnp.bfloat16
    assert jnp.allclose(y_bf16.astype(jnp.float32), y_ref, atol=7e-3, rtol=5e-2), \
        float(jnp.max(jnp.abs(y_bf16.astype(jnp.float32) - y_ref)))

    print("KERNEL_OK")
</pallas_src>

<mosaic_0001>
module attributes {stable_mosaic.version = 11 : i64} {
  func.func @_proj_kernel_lane_packed(%arg0: i32, %arg1: i32, %arg2: memref<1x4x256xf32, #tpu.memory_space<vmem>>, %arg3: memref<4x32xf32, #tpu.memory_space<vmem>>, %arg4: memref<1x32xf32, #tpu.memory_space<vmem>>, %arg5: memref<1x64x128xf32, #tpu.memory_space<vmem>>) attributes {dimension_semantics = [#tpu.dimension_semantics<parallel>, #tpu.dimension_semantics<parallel>], iteration_bounds = array<i64: 2, 1>, scalar_prefetch = 0 : i64, scratch_operands = 0 : i64, tpu.core_type = #tpu.core_type<tc>, window_params = [{transform_indices = @transform_0, window_bounds = array<i64: 1, 4, 256>}, {pipeline_mode = #tpu.pipeline_mode<synchronous>, transform_indices = @transform_1, window_bounds = array<i64: 4, 32>}, {pipeline_mode = #tpu.pipeline_mode<synchronous>, transform_indices = @transform_2, window_bounds = array<i64: 1, 32>}, {transform_indices = @transform_3, window_bounds = array<i64: 1, 64, 128>}]} {
    %c0 = arith.constant 0 : index
    %c0_0 = arith.constant 0 : index
    %c0_1 = arith.constant 0 : index
    %0 = vector.load %arg2[%c0, %c0_0, %c0_1] : memref<1x4x256xf32, #tpu.memory_space<vmem>>, vector<1x4x256xf32>
    %1 = vector.shape_cast %0 : vector<1x4x256xf32> to vector<4x256xf32>
    %c0_2 = arith.constant 0 : index
    %c0_3 = arith.constant 0 : index
    %2 = vector.load %arg3[%c0_2, %c0_3] : memref<4x32xf32, #tpu.memory_space<vmem>>, vector<4x32xf32>
    %cst = arith.constant dense<0.000000e+00> : vector<256x32xf32>
    %3 = tpu.matmul %1, %2, %cst {dimension_numbers = #tpu.dot_dimension_numbers<[0], [0], [1], [1], [0, 1, 1, 1], [], []>} : vector<4x256xf32>, vector<4x32xf32>, vector<256x32xf32> -> vector<256x32xf32>
    %c0_4 = arith.constant 0 : index
    %c0_5 = arith.constant 0 : index
    %4 = vector.load %arg4[%c0_4, %c0_5] : memref<1x32xf32, #tpu.memory_space<vmem>>, vector<1x32xf32>
    %5 = vector.broadcast %4 : vector<1x32xf32> to vector<256x32xf32>
    %6 = arith.addf %3, %5 : vector<256x32xf32>
    %7 = vector.shape_cast %6 : vector<256x32xf32> to vector<64x128xf32>
    %c0_6 = arith.constant 0 : index
    %c0_7 = arith.constant 0 : index
    %c0_8 = arith.constant 0 : index
    %8 = vector.load %arg5[%c0_6, %c0_7, %c0_8] : memref<1x64x128xf32, #tpu.memory_space<vmem>>, vector<1x64x128xf32>
    %9 = vector.shape_cast %8 : vector<1x64x128xf32> to vector<64x128xf32>
    %10 = vector.shape_cast %7 : vector<64x128xf32> to vector<1x64x128xf32>
    tpu.vector_store %arg5[%c0_6, %c0_7, %c0_8], %10 {strides = array<i32>} : memref<1x64x128xf32, #tpu.memory_space<vmem>>, vector<1x64x128xf32>,
    return
  }
  func.func @transform_0(%arg0: i32, %arg1: i32) -> (i32, i32, i32) {
    %c0_i32 = arith.constant 0 : i32
    %c0_i32_0 = arith.constant 0 : i32
    return %arg0, %c0_i32, %arg1 : i32, i32, i32
  }
  func.func @transform_1(%arg0: i32, %arg1: i32) -> (i32, i32) {
    %c0_i32 = arith.constant 0 : i32
    %c0_i32_0 = arith.constant 0 : i32
    %c0_i32_1 = arith.constant 0 : i32
    return %c0_i32, %c0_i32_0 : i32, i32
  }
  func.func @transform_2(%arg0: i32, %arg1: i32) -> (i32, i32) {
    %c0_i32 = arith.constant 0 : i32
    %c0_i32_0 = arith.constant 0 : i32
    %c0_i32_1 = arith.constant 0 : i32
    return %c0_i32, %c0_i32_0 : i32, i32
  }
  func.func @transform_3(%arg0: i32, %arg1: i32) -> (i32, i32, i32) {
    %c0_i32 = arith.constant 0 : i32
    %c0_i32_0 = arith.constant 0 : i32
    return %arg0, %arg1, %c0_i32 : i32, i32, i32
  }
}

module attributes {stable_mosaic.version = 11 : i64} {
  func.func @_proj_kernel_direct(%arg0: i32, %arg1: i32, %arg2: memref<1x4x256xf32, #tpu.memory_space<vmem>>, %arg3: memref<4x32xf32, #tpu.memory_space<vmem>>, %arg4: memref<1x32xf32, #tpu.memory_space<vmem>>, %arg5: memref<1x256x32xf32, #tpu.memory_space<vmem>>) attributes {dimension_semantics = [#tpu.dimension_semantics<parallel>, #tpu.dimension_semantics<parallel>], iteration_bounds = array<i64: 2, 1>, scalar_prefetch = 0 : i64, scratch_operands = 0 : i64, tpu.core_type = #tpu.core_type<tc>, window_params = [{transform_indices = @transform_0, window_bounds = array<i64: 1, 4, 256>}, {pipeline_mode = #tpu.pipeline_mode<synchronous>, transform_indices = @transform_1, window_bounds = array<i64: 4, 32>}, {pipeline_mode = #tpu.pipeline_mode<synchronous>, transform_indices = @transform_2, window_bounds = array<i64: 1, 32>}, {transform_indices = @transform_3, window_bounds = array<i64: 1, 256, 32>}]} {
    %c0 = arith.constant 0 : index
    %c0_0 = arith.constant 0 : index
    %c0_1 = arith.constant 0 : index
    %0 = vector.load %arg2[%c0, %c0_0, %c0_1] : memref<1x4x256xf32, #tpu.memory_space<vmem>>, vector<1x4x256xf32>
    %1 = vector.shape_cast %0 : vector<1x4x256xf32> to vector<4x256xf32>
    %c0_2 = arith.constant 0 : index
    %c0_3 = arith.constant 0 : index
    %2 = vector.load %arg3[%c0_2, %c0_3] : memref<4x32xf32, #tpu.memory_space<vmem>>, vector<4x32xf32>
    %cst = arith.constant dense<0.000000e+00> : vector<256x32xf32>
    %3 = tpu.matmul %1, %2, %cst {dimension_numbers = #tpu.dot_dimension_numbers<[0], [0], [1], [1], [0, 1, 1, 1], [], []>} : vector<4x256xf32>, vector<4x32xf32>, vector<256x32xf32> -> vector<256x32xf32>
    %c0_4 = arith.constant 0 : index
    %c0_5 = arith.constant 0 : index
    %4 = vector.load %arg4[%c0_4, %c0_5] : memref<1x32xf32, #tpu.memory_space<vmem>>, vector<1x32xf32>
    %5 = vector.broadcast %4 : vector<1x32xf32> to vector<256x32xf32>
    %6 = arith.addf %3, %5 : vector<256x32xf32>
    %c0_6 = arith.constant 0 : index
    %c0_7 = arith.constant 0 : index
    %c0_8 = arith.constant 0 : index
    %7 = vector.load %arg5[%c0_6, %c0_7, %c0_8] : memref<1x256x32xf32, #tpu.memory_space<vmem>>, vector<1x256x32xf32>
    %8 = vector.shape_cast %7 : vector<1x256x32xf32> to vector<256x32xf32>
    %9 = vector.shape_cast %6 : vector<256x32xf32> to vector<1x256x32xf32>
    tpu.vector_store %arg5[%c0_6, %c0_7, %c0_8], %9 {strides = array<i32>} : memref<1x256x32xf32, #tpu.memory_space<vmem>>, vector<1x256x32xf32>,
    return
  }
  func.func @transform_0(%arg0: i32, %arg1: i32) -> (i32, i32, i32) {
    %c0_i32 = arith.constant 0 : i32
    %c0_i32_0 = arith.constant 0 : i32
    return %arg0, %c0_i32, %arg1 : i32, i32, i32
  }
  func.func @transform_1(%arg0: i32, %arg1: i32) -> (i32, i32) {
    %c0_i32 = arith.constant 0 : i32
    %c0_i32_0 = arith.constant 0 : i32
    %c0_i32_1 = arith.constant 0 : i32
    return %c0_i32, %c0_i32_0 : i32, i32
  }
  func.func @transform_2(%arg0: i32, %arg1: i32) -> (i32, i32) {
    %c0_i32 = arith.constant 0 : i32
    %c0_i32_0 = arith.constant 0 : i32
    %c0_i32_1 = arith.constant 0 : i32
    return %c0_i32, %c0_i32_0 : i32, i32
  }
  func.func @transform_3(%arg0: i32, %arg1: i32) -> (i32, i32, i32) {
    %c0_i32 = arith.constant 0 : i32
    %c0_i32_0 = arith.constant 0 : i32
    return %arg0, %arg1, %c0_i32 : i32, i32, i32
  }
}

</mosaic_0001>

<bundles_post_ra>
// kernel: tpu_custom_call.1
= control target key start
LH: loop header
LB: loop body
LE: loop exit
PB: predicated region body
PF: predicated region fallthrough
CT: control target
= control target key end

     0   :  { %8 = vsyncpa [#allocation3], 0  ;;  %s1166_s0 = inlined_call_operand.hbm [shape: f32[2,4,256], index: 0, kind: input, shape index: {}]   ;;  %s1167_s1 = inlined_call_operand.hbm [shape: f32[4,32], index: 1, kind: input, shape index: {}]   ;;  %s1168_s2 = inlined_call_operand.vmem [shape: f32[1,32], index: 2, kind: input, shape index: {}]   ;;  %s1169_s3 = inlined_call_operand.vmem [shape: f32[2,256,32], index: 3, kind: output, shape index: {}]  }
   0x1   :  { %10 = vsyncpa [#allocation3 + $0x1], 0 }
   0x2   :  { %11 = vsyncpa [#allocation5], 0  ;;  %s920_s12 = smov 0   ;;  %s922_s13 = smov 0  }
   0x3   :  { %s924_s14 = smov 0   ;;  %s926_s15 = smov 0  }
   0x4   :  { %s928_s16 = smov 0   ;;  %s930_s17 = smov 0  }
   0x5 LB: > { %s662_s18 = sadd.s32 4294967295, %s897_s17   ;;  %p51_p0 = scmp.ne.s32.totalorder %s881_s13, %s877_s12  ;;  %s897_s17 = sphi %s930_s17, %s17_s17   ;;  %s893_s16 = sphi %s928_s16, %s1178_s16   ;;  %s889_s15 = sphi %s926_s15, %s1177_s15   ;;  %s885_s14 = sphi %s924_s14, %s1176_s14   ;;  %s881_s13 = sphi %s922_s13, %s1175_s13   ;;  %s877_s12 = sphi %s920_s12, %s1174_s12  }
   0x6   : > { %p950_p1 = scmp.eq.s32.totalorder %s662_s18, 0  ;;  %p664_p2 = scmp.ge.s32.totalorder %s897_s17, 1 }
   0x7   : > { %p132_p3 = scmp.lt.s32.totalorder %s897_s17, 3  ;;  %s144_s23 = sshll.u32 %s1167_s1, 4  ;;  %s145_s23 = int_to_ptr.hbm [resolvable:$true] %s144_s23 }
   0x8   : > { %p958_p4 = por %p950_p1, %p51_p0  ;;  %s899_s25 = smov [#allocation4]  }
   0x9   : > { %p965_p5 = pnand %p664_p2, %p132_p3  ;;  %s146_s26 = sshll.u32 %s899_s25, 4  ;;  %s147_s26 = int_to_ptr.vmem [resolvable:$true] %s146_s26 }
   0xa   : > { %s29_s27 = sadd.s32 1, %s893_s16  ;;  %p45_p9 = scmp.ne.s32.totalorder %s885_s14, %s881_s13 }
   0xb   : > { %p721_p6 = pneg %p965_p5  ;;  %p31_p8 = scmp.ge.s32.totalorder %s29_s27, 2 }
   0xc   : > { %p46_p10 = scmp.eq.s32.totalorder %s897_s17, 0  ;;  %s38_s28 = sadd.s32 1, %s885_s14 }
   0xd   : > { %p722_p7 = pnand %p721_p6, %p950_p1  ;;  %s1180_s27 = smov (%p31_p8, %s29_s27), 0 }
   0xe   : > { %p980_p11 = por %p46_p10, %p45_p9  ;;  %s33_s30 = ssub.s32 %s893_s16, %s1180_s27 }
   0xf   : > { %724 = dma.hbm_to_vmem [thread:$0]  (!%p722_p7), %s145_s23, 64, %s147_s26, [#allocation5]  }
  0x10   : > { %s160_s4 = sand.u32 1, %s885_s14   ;;  %p36_p12 = scmp.eq.s32.totalorder %s33_s30, 0 }
  0x11   : > { %p730_p13 = scmp.lt.s32.totalorder %s897_s17, 2  ;;  %s667_s5 = sshll.u32 %s160_s4, 3 }
  0x12   : > { %s710_s6 = sshll.u32 %s893_s16, 3  ;;  %s164_s12 = scalar_lea.vmem [#allocation2], %s667_s5 }
  0x13   : > { %s990_s7 = scalar_select %p36_p12, %s885_s14, %s38_s28  }
  0x14   : > { %s171_s10 = scalar_lea.hbm %s1166_s0, %s710_s6  ;;  %s175_s18 = sshll.u32 %s164_s12, 4  ;;  %s176_s18 = int_to_ptr.vmem [resolvable:$true] %s175_s18 }
  0x15   : > { %s173_s11 = sshll.u32 %s171_s10, 4  ;;  %p726_p0 = pnand %p730_p13, %p980_p11  ;;  %s174_s11 = int_to_ptr.hbm [resolvable:$true] %s173_s11 }
  0x16   : > { %s161_s21 = scalar_lea.sflag [#allocation3], %s160_s4  ;;  %184 = sbr.rel (%p965_p5) target bundleno = 581 (0x245), region = 32 }
  0x17   : > { %728 = dma.hbm_to_vmem [thread:$0]  (!%p726_p0), %s174_s11, 128, %s176_s18, %s161_s21  }
  0x18   : > { %s186_s22 = sand.u32 (!%p965_p5), 1, %s881_s13  }
  0x19   : > { %s671_s23 = sshll.u32 (!%p965_p5), %s186_s22, 3  ;;  %s187_s25 = scalar_lea.sflag (!%p965_p5), [#allocation3], %s186_s22 }
  0x1a   : > { %s190_s26 = scalar_lea.vmem (!%p965_p5), [#allocation2], %s671_s23 }
  0x1b   : > { %868 = dma.done.wait (%p958_p4), %s187_s25, 128  }
  0x1c   : > { %870 = vsyncadd (%p958_p4), %s187_s25, 4294967168 }
  0x1d   : > { %872 = dma.done.wait (%p950_p1), [#allocation5], 64  }
  0x1e   : > { %874 = vsyncadd (%p950_p1), [#allocation5], 4294967232  ;;  %v234_v0 = vld [vmem:[%s190_s26] sm:$0xff]  ;;  %v235_v2 = vld [vmem:[#allocation4] sm:$0xf]  ;;  %vm407_vm0 = vcmask 1043456  }
  0x1f   : > { %241 = vst [vmem:[#allocation1] ss:$2 sm:$0xff] %v234_v0  ;;  %713 = vmatpush.msk.msra.mxu2 %vm407_vm0, %v235_v2  ;;  %714 = vmatpush.msk.msra.mxu3 %vm407_vm0, %v235_v2  ;;  %vm310_vm1 = vcmask 31744   ;;  %p225_p1 = scmp.lt.s32.totalorder %s889_s15, 1  ;;  %v1030_v21 = vld [vmem:[%s1168_s2] ss:$0 sm:$0xff] }
  0x20   : > { %675 = vmatpush.msk.msra.mxu0 %vm407_vm0, %v235_v2  ;;  %712 = vmatpush.msk.msra.mxu1 %vm407_vm0, %v235_v2  ;;  %vm524_vm2 = vcmask 261120  }
  0x21   : > { %s1182_s15 = smov (!%p225_p1, %s889_s15), 1 }
  0x22   : > { %s711_s19 = sshll.u32 %s1182_s15, 8 }
  0x23   : > { %s1035_s30 = scalar_lea.vmem %s1169_s3, %s711_s19 }
  0x26   : > { %v243_v1 = vld.sshfl [vmem:[#allocation1 + $0x8] sm:$0xff pattern:$0x75316420]  ;;  %v242_v3 = vld.sshfl [vmem:[#allocation1] sm:$0xff pattern:$0x75316420] }
  0x27   : > { %278 = vxpose.xlu0.b32.start.end [1/1] (short) %v243_v1, 128 }
  0xa7   : > { %246 = vxpose.xlu0.b32.start.end [1/1] (short) %v242_v3, 128 }
  0xcb   : > { %v294_v4 = vpop.trf.xlu0 }
  0xcc   : > { %692 = vmatmul.msk.f32.vlgmr.msra.gmra.mxu2 %vm310_vm1, %v294_v4 }
  0xd3   : > { %v295_v5 = vpop.trf.xlu0 }
  0xd4   : > { %693 = vmatmul.msk.f32.gmra.mxu2 %vm310_vm1, %v295_v5 }
  0xdb   : > { %v296_v6 = vpop.trf.xlu0 }
  0xdc   : > { %694 = vmatmul.msk.f32.gmra.mxu2 %vm310_vm1, %v296_v6 }
  0xe3   : > { %v297_v7 = vpop.trf.xlu0 }
  0xe4   : > { %695 = vmatmul.msk.f32.gmra.mxu2 %vm310_vm1, %v297_v7 }
  0xeb   : > { %v298_v8 = vpop.trf.xlu0 }
  0xec   : > { %696 = vmatmul.msk.f32.gmra.mxu2 %vm310_vm1, %v298_v8 }
  0xf3   : > { %v299_v9 = vpop.trf.xlu0 }
  0xf4   : > { %697 = vmatmul.msk.f32.gmra.mxu2 %vm310_vm1, %v299_v9 }
  0xfb   : > { %v300_v10 = vpop.trf.xlu0 }
  0xfc   : > { %698 = vmatmul.msk.f32.gmra.mxu2 %vm310_vm1, %v300_v10 }
 0x103   : > { %v301_v11 = vpop.trf.xlu0 }
 0x104   : > { %699 = vmatmul.msk.f32.gmra.mxu2 %vm310_vm1, %v301_v11 }
 0x10b   : > { %v302_v12 = vpop.trf.xlu0 }
 0x10c   : > { %700 = vmatmul.msk.f32.vlgmr.msra.gmra.mxu3 %vm310_vm1, %v302_v12 }
 0x113   : > { %v303_v13 = vpop.trf.xlu0 }
 0x114   : > { %701 = vmatmul.msk.f32.gmra.mxu3 %vm310_vm1, %v303_v13 }
 0x11b   : > { %v304_v14 = vpop.trf.xlu0 }
 0x11c   : > { %702 = vmatmul.msk.f32.gmra.mxu3 %vm310_vm1, %v304_v14 }
 0x123   : > { %v305_v15 = vpop.trf.xlu0 }
 0x124   : > { %703 = vmatmul.msk.f32.gmra.mxu3 %vm310_vm1, %v305_v15 }
 0x12b   : > { %v306_v16 = vpop.trf.xlu0 }
 0x12c   : > { %704 = vmatmul.msk.f32.gmra.mxu3 %vm310_vm1, %v306_v16 }
 0x133   : > { %v307_v17 = vpop.trf.xlu0 }
 0x134   : > { %705 = vmatmul.msk.f32.gmra.mxu3 %vm310_vm1, %v307_v17 }
 0x13b   : > { %v308_v18 = vpop.trf.xlu0 }
 0x13c   : > { %706 = vmatmul.msk.f32.gmra.mxu3 %vm310_vm1, %v308_v18 }
 0x143   : > { %v309_v19 = vpop.trf.xlu0 }
 0x144   : > { %707 = vmatmul.msk.f32.gmra.mxu3 %vm310_vm1, %v309_v19 }
 0x14b   : > { %v262_v20 = vpop.trf.xlu0 }
 0x14c   : > { %676 = vmatmul.msk.f32.vlgmr.msra.gmra.mxu0 %vm310_vm1, %v262_v20 }
 0x14f   : > { %v476_v22 = vpop.f32.mrf.mxu2 }
 0x150   : > { %v477_v23 = vadd.f32 %v1030_v21, %v476_v22 }
 0x152   : > { %541 = vst.msk [vmem:[%s1035_s30 + $0x80] sm:$0xff] %vm524_vm2, %v477_v23 }
 0x153   : > { %v263_v24 = vpop.trf.xlu0 }
 0x154   : > { %677 = vmatmul.msk.f32.gmra.mxu0 %vm310_vm1, %v263_v24 }
 0x157   : > { %v479_v25 = vpop.f32.mrf.mxu2 }
 0x158   : > { %v480_v26 = vadd.f32 %v1030_v21, %v479_v25 }
 0x15a   : > { %542 = vst.msk [vmem:[%s1035_s30 + $0x88] sm:$0xff] %vm524_vm2, %v480_v26 }
 0x15b   : > { %v264_v27 = vpop.trf.xlu0 }
 0x15c   : > { %678 = vmatmul.msk.f32.gmra.mxu0 %vm310_vm1, %v264_v27 }
 0x15f   : > { %v482_v28 = vpop.f32.mrf.mxu2 }
 0x160   : > { %v483_v29 = vadd.f32 %v1030_v21, %v482_v28 }
 0x162   : > { %543 = vst.msk [vmem:[%s1035_s30 + $0x90] sm:$0xff] %vm524_vm2, %v483_v29 }
 0x163   : > { %v265_v30 = vpop.trf.xlu0 }
 0x164   : > { %679 = vmatmul.msk.f32.gmra.mxu0 %vm310_vm1, %v265_v30 }
 0x167   : > { %v485_v31 = vpop.f32.mrf.mxu2 }
 0x168   : > { %v486_v32 = vadd.f32 %v1030_v21, %v485_v31 }
 0x16a   : > { %544 = vst.msk [vmem:[%s1035_s30 + $0x98] sm:$0xff] %vm524_vm2, %v486_v32 }
 0x16b   : > { %v266_v33 = vpop.trf.xlu0 }
 0x16c   : > { %680 = vmatmul.msk.f32.gmra.mxu0 %vm310_vm1, %v266_v33 }
 0x16f   : > { %v488_v34 = vpop.f32.mrf.mxu2 }
 0x170   : > { %v489_v35 = vadd.f32 %v1030_v21, %v488_v34 }
 0x172   : > { %545 = vst.msk [vmem:[%s1035_s30 + $0xa0] sm:$0xff] %vm524_vm2, %v489_v35 }
 0x173   : > { %v267_v36 = vpop.trf.xlu0 }
 0x174   : > { %681 = vmatmul.msk.f32.gmra.mxu0 %vm310_vm1, %v267_v36 }
 0x177   : > { %v491_v37 = vpop.f32.mrf.mxu2 }
 0x178   : > { %v492_v38 = vadd.f32 %v1030_v21, %v491_v37 }
 0x17a   : > { %546 = vst.msk [vmem:[%s1035_s30 + $0xa8] sm:$0xff] %vm524_vm2, %v492_v38 }
 0x17b   : > { %v268_v39 = vpop.trf.xlu0 }
 0x17c   : > { %682 = vmatmul.msk.f32.gmra.mxu0 %vm310_vm1, %v268_v39 }
 0x17f   : > { %v494_v40 = vpop.f32.mrf.mxu2 }
 0x180   : > { %v495_v41 = vadd.f32 %v1030_v21, %v494_v40 }
 0x182   : > { %547 = vst.msk [vmem:[%s1035_s30 + $0xb0] sm:$0xff] %vm524_vm2, %v495_v41 }
 0x183   : > { %v269_v42 = vpop.trf.xlu0 }
 0x184   : > { %683 = vmatmul.msk.f32.gmra.mxu0 %vm310_vm1, %v269_v42 }
 0x187   : > { %v497_v43 = vpop.f32.mrf.mxu2 }
 0x188   : > { %v498_v44 = vadd.f32 %v1030_v21, %v497_v43 }
 0x18a   : > { %548 = vst.msk [vmem:[%s1035_s30 + $0xb8] sm:$0xff] %vm524_vm2, %v498_v44 }
 0x18b   : > { %v270_v45 = vpop.trf.xlu0 }
 0x18c   : > { %684 = vmatmul.msk.f32.vlgmr.msra.gmra.mxu1 %vm310_vm1, %v270_v45 }
 0x18f   : > { %v500_v46 = vpop.f32.mrf.mxu3 }
 0x190   : > { %v501_v47 = vadd.f32 %v1030_v21, %v500_v46 }
 0x192   : > { %549 = vst.msk [vmem:[%s1035_s30 + $0xc0] sm:$0xff] %vm524_vm2, %v501_v47 }
 0x193   : > { %v271_v48 = vpop.trf.xlu0 }
 0x194   : > { %685 = vmatmul.msk.f32.gmra.mxu1 %vm310_vm1, %v271_v48 }
 0x197   : > { %v503_v49 = vpop.f32.mrf.mxu3 }
 0x198   : > { %v504_v50 = vadd.f32 %v1030_v21, %v503_v49 }
 0x19a   : > { %550 = vst.msk [vmem:[%s1035_s30 + $0xc8] sm:$0xff] %vm524_vm2, %v504_v50 }
 0x19b   : > { %v272_v51 = vpop.trf.xlu0 }
 0x19c   : > { %686 = vmatmul.msk.f32.gmra.mxu1 %vm310_vm1, %v272_v51 }
 0x19f   : > { %v506_v52 = vpop.f32.mrf.mxu3 }
 0x1a0   : > { %v507_v53 = vadd.f32 %v1030_v21, %v506_v52 }
 0x1a2   : > { %551 = vst.msk [vmem:[%s1035_s30 + $0xd0] sm:$0xff] %vm524_vm2, %v507_v53 }
 0x1a3   : > { %v273_v54 = vpop.trf.xlu0 }
 0x1a4   : > { %687 = vmatmul.msk.f32.gmra.mxu1 %vm310_vm1, %v273_v54 }
 0x1a7   : > { %v509_v55 = vpop.f32.mrf.mxu3 }
 0x1a8   : > { %v510_v56 = vadd.f32 %v1030_v21, %v509_v55 }
 0x1aa   : > { %552 = vst.msk [vmem:[%s1035_s30 + $0xd8] sm:$0xff] %vm524_vm2, %v510_v56 }
 0x1ab   : > { %v274_v57 = vpop.trf.xlu0 }
 0x1ac   : > { %688 = vmatmul.msk.f32.gmra.mxu1 %vm310_vm1, %v274_v57 }
 0x1af   : > { %v512_v58 = vpop.f32.mrf.mxu3 }
 0x1b0   : > { %v513_v59 = vadd.f32 %v1030_v21, %v512_v58 }
 0x1b2   : > { %553 = vst.msk [vmem:[%s1035_s30 + $0xe0] sm:$0xff] %vm524_vm2, %v513_v59 }
 0x1b3   : > { %v275_v60 = vpop.trf.xlu0 }
 0x1b4   : > { %689 = vmatmul.msk.f32.gmra.mxu1 %vm310_vm1, %v275_v60 }
 0x1b7   : > { %v515_v61 = vpop.f32.mrf.mxu3 }
 0x1b8   : > { %v516_v62 = vadd.f32 %v1030_v21, %v515_v61 }
 0x1ba   : > { %554 = vst.msk [vmem:[%s1035_s30 + $0xe8] sm:$0xff] %vm524_vm2, %v516_v62 }
 0x1bb   : > { %v276_v63 = vpop.trf.xlu0 }
 0x1bc   : > { %690 = vmatmul.msk.f32.gmra.mxu1 %vm310_vm1, %v276_v63 }
 0x1bf   : > { %v518_v0 = vpop.f32.mrf.mxu3 }
 0x1c0   : > { %v519_v1 = vadd.f32 %v1030_v21, %v518_v0 }
 0x1c2   : > { %555 = vst.msk [vmem:[%s1035_s30 + $0xf0] sm:$0xff] %vm524_vm2, %v519_v1 }
 0x1c3   : > { %v277_v2 = vpop.trf.xlu0 }
 0x1c4   : > { %691 = vmatmul.msk.f32.gmra.mxu1 %vm310_vm1, %v277_v2 }
 0x1c7   : > { %v521_v3 = vpop.f32.mrf.mxu3 }
 0x1c8   : > { %v522_v4 = vadd.f32 %v1030_v21, %v521_v3 }
 0x1c9   : > { %v428_v5 = vpop.f32.mrf.mxu0 }
 0x1ca   : > { %556 = vst.msk [vmem:[%s1035_s30 + $0xf8] sm:$0xff] %vm524_vm2, %v522_v4  ;;  %v429_v6 = vadd.f32 %v1030_v21, %v428_v5 }
 0x1cc   : > { %525 = vst.msk [vmem:[%s1035_s30] sm:$0xff] %vm524_vm2, %v429_v6 }
 0x1d1   : > { %v431_v7 = vpop.f32.mrf.mxu0 }
 0x1d2   : > { %v432_v8 = vadd.f32 %v1030_v21, %v431_v7 }
 0x1d4   : > { %526 = vst.msk [vmem:[%s1035_s30 + $0x8] sm:$0xff] %vm524_vm2, %v432_v8 }
 0x1d9   : > { %v434_v9 = vpop.f32.mrf.mxu0 }
 0x1da   : > { %v435_v10 = vadd.f32 %v1030_v21, %v434_v9 }
 0x1dc   : > { %527 = vst.msk [vmem:[%s1035_s30 + $0x10] sm:$0xff] %vm524_vm2, %v435_v10 }
 0x1e1   : > { %v437_v11 = vpop.f32.mrf.mxu0 }
 0x1e2   : > { %v438_v12 = vadd.f32 %v1030_v21, %v437_v11 }
 0x1e4   : > { %528 = vst.msk [vmem:[%s1035_s30 + $0x18] sm:$0xff] %vm524_vm2, %v438_v12 }
 0x1e9   : > { %v440_v13 = vpop.f32.mrf.mxu0 }
 0x1ea   : > { %v441_v14 = vadd.f32 %v1030_v21, %v440_v13 }
 0x1ec   : > { %529 = vst.msk [vmem:[%s1035_s30 + $0x20] sm:$0xff] %vm524_vm2, %v441_v14 }
 0x1f1   : > { %v443_v15 = vpop.f32.mrf.mxu0 }
 0x1f2   : > { %v444_v16 = vadd.f32 %v1030_v21, %v443_v15 }
 0x1f4   : > { %530 = vst.msk [vmem:[%s1035_s30 + $0x28] sm:$0xff] %vm524_vm2, %v444_v16 }
 0x1f9   : > { %v446_v17 = vpop.f32.mrf.mxu0 }
 0x1fa   : > { %v447_v18 = vadd.f32 %v1030_v21, %v446_v17 }
 0x1fc   : > { %531 = vst.msk [vmem:[%s1035_s30 + $0x30] sm:$0xff] %vm524_vm2, %v447_v18 }
 0x201   : > { %v449_v19 = vpop.f32.mrf.mxu0 }
 0x202   : > { %v450_v20 = vadd.f32 %v1030_v21, %v449_v19 }
 0x204   : > { %532 = vst.msk [vmem:[%s1035_s30 + $0x38] sm:$0xff] %vm524_vm2, %v450_v20 }
 0x209   : > { %v452_v22 = vpop.f32.mrf.mxu1 }
 0x20a   : > { %v453_v23 = vadd.f32 %v1030_v21, %v452_v22 }
 0x20c   : > { %533 = vst.msk [vmem:[%s1035_s30 + $0x40] sm:$0xff] %vm524_vm2, %v453_v23 }
 0x211   : > { %v455_v24 = vpop.f32.mrf.mxu1 }
 0x212   : > { %v456_v25 = vadd.f32 %v1030_v21, %v455_v24 }
 0x214   : > { %534 = vst.msk [vmem:[%s1035_s30 + $0x48] sm:$0xff] %vm524_vm2, %v456_v25 }
 0x219   : > { %v458_v26 = vpop.f32.mrf.mxu1 }
 0x21a   : > { %v459_v27 = vadd.f32 %v1030_v21, %v458_v26 }
 0x21c   : > { %535 = vst.msk [vmem:[%s1035_s30 + $0x50] sm:$0xff] %vm524_vm2, %v459_v27 }
 0x221   : > { %v461_v28 = vpop.f32.mrf.mxu1 }
 0x222   : > { %v462_v29 = vadd.f32 %v1030_v21, %v461_v28 }
 0x224   : > { %536 = vst.msk [vmem:[%s1035_s30 + $0x58] sm:$0xff] %vm524_vm2, %v462_v29 }
 0x229   : > { %v464_v30 = vpop.f32.mrf.mxu1 }
 0x22a   : > { %v465_v31 = vadd.f32 %v1030_v21, %v464_v30 }
 0x22c   : > { %537 = vst.msk [vmem:[%s1035_s30 + $0x60] sm:$0xff] %vm524_vm2, %v465_v31 }
 0x231   : > { %v467_v32 = vpop.f32.mrf.mxu1 }
 0x232   : > { %v468_v33 = vadd.f32 %v1030_v21, %v467_v32 }
 0x234   : > { %538 = vst.msk [vmem:[%s1035_s30 + $0x68] sm:$0xff] %vm524_vm2, %v468_v33 }
 0x239   : > { %v470_v34 = vpop.f32.mrf.mxu1 }
 0x23a   : > { %v471_v35 = vadd.f32 %v1030_v21, %v470_v34 }
 0x23c   : > { %539 = vst.msk [vmem:[%s1035_s30 + $0x70] sm:$0xff] %vm524_vm2, %v471_v35 }
 0x241   : > { %v473_v36 = vpop.f32.mrf.mxu1 }
 0x242   : > { %v474_v37 = vadd.f32 %v1030_v21, %v473_v36 }
 0x244   : > { %540 = vst.msk [vmem:[%s1035_s30 + $0x78] sm:$0xff] %vm524_vm2, %v474_v37 }
 0x245 PF: > { %s17_s17 = sadd.s32 1, %s897_s17   ;;  %s1174_s12 = smov %s881_s13 }
 0x246   : > { %p14_p2 = scmp.ge.s32.totalorder %s17_s17, 4   ;;  %s1175_s13 = smov %s885_s14 }
 0x247   : > { %s1176_s14 = smov %s990_s7  ;;  %s1177_s15 = smov %s893_s16 }
 0x248   : > { %s1178_s16 = smov %s1180_s27  ;;  %16 = sbr.rel (!%p14_p2) target bundleno = 5 (0x5), region = 76 }
 0x24d   :  { %587 = vsyncpa [#allocation3], 1 }
 0x24e   :  { %589 = vsyncpa [#allocation3 + $0x1], 1 }
 0x24f   :  { %590 = vsyncpa [#allocation5], 1 }

</bundles_post_ra>
